<compile_context>
chip_gen: v7x
topology: tpu7x:2x2x1
jax: 0.10.0
libtpu: 0.0.40
codegen_flags: <defaults>
</compile_context>

<pallas_src>
import functools

import jax
import jax.numpy as jnp
from jax import lax
from jax.experimental import pallas as pl
from jax.experimental.pallas import tpu as pltpu


# ----------------------------- JAX glue (sampling / grouping) ------------------

def index_points(points, idx):
    # points [B, N, C], idx [B, ...] -> [B, ..., C]
    return jax.vmap(lambda p, i: p[i])(points, idx)


def square_distance(src, dst):
    # src [B, N, C], dst [B, M, C] -> [B, N, M]
    dist = -2.0 * jnp.einsum("bnc,bmc->bnm", src, dst)
    dist = dist + jnp.sum(src ** 2, axis=-1)[:, :, None]
    dist = dist + jnp.sum(dst ** 2, axis=-1)[:, None, :]
    return dist


def farthest_point_sample(xyz, npoint):
    # xyz [B, N, 3] -> centroid indices [B, npoint]
    # (reference uses a random start point; we use a deterministic start = 0)
    B, N, _ = xyz.shape

    def body(i, state):
        centroids, distance, farthest = state
        centroids = centroids.at[:, i].set(farthest)
        centroid = index_points(xyz, farthest[:, None])          # [B, 1, 3]
        dist = jnp.sum((xyz - centroid) ** 2, axis=-1)           # [B, N]
        distance = jnp.minimum(distance, dist)
        farthest = jnp.argmax(distance, axis=-1).astype(jnp.int32)
        return centroids, distance, farthest

    centroids = jnp.zeros((B, npoint), jnp.int32)
    distance = jnp.full((B, N), 1e10, jnp.float32)
    farthest = jnp.zeros((B,), jnp.int32)
    centroids, _, _ = lax.fori_loop(0, npoint, body, (centroids, distance, farthest))
    return centroids


def query_ball_point(radius, nsample, xyz, new_xyz):
    # xyz [B, N, 3], new_xyz [B, S, 3] -> group_idx [B, S, nsample]
    B, N, _ = xyz.shape
    S = new_xyz.shape[1]
    sqrdists = square_distance(new_xyz, xyz)                     # [B, S, N]
    group_idx = jnp.broadcast_to(jnp.arange(N, dtype=jnp.int32), (B, S, N))
    group_idx = jnp.where(sqrdists > radius ** 2, N, group_idx)
    group_idx = jnp.sort(group_idx, axis=-1)[:, :, :nsample]
    group_first = jnp.broadcast_to(group_idx[:, :, :1], group_idx.shape)
    group_idx = jnp.where(group_idx == N, group_first, group_idx)
    return group_idx


# ----------------------------- Pallas kernel -----------------------------------

def _mlp_max_kernel(x_ref, *rest, num_layers, tn, K):
    """x_ref: (1, tn*K, C0) grouped features (compute dtype, e.g. bf16).
    Per layer: (w (Cin,Cout) compute dtype, b (1,Cout) f32) with BN folded in.
    out_ref: (1, C_last, tn) -- point axis on lanes (lane-dense store)."""
    out_ref = rest[-1]
    param_refs = rest[:-1]

    h = x_ref[0]                                                  # (tn*K, C0)
    for j in range(num_layers):
        w = param_refs[2 * j][...]                                # (Cin, Cout)
        b = param_refs[2 * j + 1][...]                            # (1, Cout) f32
        h = jnp.dot(h.astype(w.dtype), w,
                    preferred_element_type=jnp.float32)           # f32 accum
        h = jnp.maximum(h + b, 0.0)                               # bias+ReLU in f32

    c_last = h.shape[-1]
    pooled = jnp.max(h.reshape(tn, K, c_last), axis=1)            # (tn, C_last) f32
    out_ref[0] = jnp.transpose(pooled).astype(out_ref.dtype)      # (C_last, tn)


def mlp_max_pallas(grouped, folded_ws, folded_bs, *, tn_target=128,
                   compute_dtype=jnp.bfloat16, out_dtype=jnp.float32):
    """grouped: [B, S, K, C0]  ->  [B, C_last, S]  (PyTorch channel-first)."""
    B, S, K, C0 = grouped.shape
    num_layers = len(folded_ws)
    c_last = folded_ws[-1].shape[1]

    # ---- choose the point tile (lane axis of the output) ----
    if S <= tn_target:
        tn, s_pad = S, S                       # single tile: full dims are legal
    else:
        tn = max(128, (tn_target // 128) * 128)  # multiple of 128 -> lane-dense
        s_pad = ((S + tn - 1) // tn) * tn
    if s_pad != S:
        grouped = jnp.pad(grouped, ((0, 0), (0, s_pad - S), (0, 0), (0, 0)))

    # Flatten (S, K) -> S*K in HBM (free reshape) so the kernel tile is 2-D.
    x = grouped.astype(compute_dtype).reshape(B, s_pad * K, C0)
    ws = [w.astype(compute_dtype) for w in folded_ws]
    bs = [b.astype(jnp.float32) for b in folded_bs]               # (1, Cout)

    grid = (s_pad // tn, B)                    # point-tile axis first (v7x 2 TCs)

    in_specs = [pl.BlockSpec((1, tn * K, C0), lambda i, b: (b, i, 0))]
    params = []
    for w_i, b_i in zip(ws, bs):
        in_specs.append(pl.BlockSpec(w_i.shape, lambda i, b: (0, 0)))
        in_specs.append(pl.BlockSpec(b_i.shape, lambda i, b: (0, 0)))
        params.extend([w_i, b_i])

    out_spec = pl.BlockSpec((1, c_last, tn), lambda i, b: (b, 0, i))

    kernel = functools.partial(_mlp_max_kernel, num_layers=num_layers, tn=tn, K=K)
    out = pl.pallas_call(
        kernel,
        out_shape=jax.ShapeDtypeStruct((B, c_last, s_pad), out_dtype),
        grid=grid,
        in_specs=in_specs,
        out_specs=out_spec,
        compiler_params=pltpu.CompilerParams(
            dimension_semantics=("parallel", "parallel"),
            vmem_limit_bytes=32 * 1024 * 1024),
    )(x, *params)

    return out[:, :, :S] if s_pad != S else out


# ----------------------------- Module wrapper -----------------------------------

class PointNetSetAbstractionPallas:
    def __init__(self, npoint, radius, nsample, in_channel, mlp, group_all, key):
        self.npoint = npoint
        self.radius = radius
        self.nsample = nsample
        self.group_all = group_all
        self.eps = 1e-5
        self.params = []   # per layer: (W [Cin,Cout], bias, gamma, beta, mean, var)
        last_channel = in_channel
        for out_channel in mlp:
            key, kw, kb, kg, kbeta = jax.random.split(key, 5)
            W = 0.1 * jax.random.normal(kw, (last_channel, out_channel), jnp.float32)
            bias = 0.1 * jax.random.normal(kb, (out_channel,), jnp.float32)
            gamma = 1.0 + 0.1 * jax.random.normal(kg, (out_channel,), jnp.float32)
            beta = 0.1 * jax.random.normal(kbeta, (out_channel,), jnp.float32)
            mean = jnp.zeros((out_channel,), jnp.float32)
            var = jnp.ones((out_channel,), jnp.float32)
            self.params.append((W, bias, gamma, beta, mean, var))
            last_channel = out_channel

    def _folded_params(self):
        # BN in eval mode (running stats) folded into the 1x1 conv.
        ws, bs = [], []
        for (W, bias, gamma, beta, mean, var) in self.params:
            scale = gamma / jnp.sqrt(var + self.eps)               # (Cout,)
            ws.append(W * scale[None, :])
            bs.append(((bias - mean) * scale + beta)[None, :])     # (1, Cout)
        return ws, bs

    def _group(self, xyz_t, points_t):
        # xyz_t [B, N, 3], points_t [B, N, D] or None
        B, N, C = xyz_t.shape
        if self.group_all:
            new_xyz_t = jnp.zeros((B, 1, C), xyz_t.dtype)
            grouped_xyz = xyz_t[:, None, :, :]                             # [B,1,N,3]
            if points_t is not None:
                grouped = jnp.concatenate(
                    [grouped_xyz, points_t[:, None, :, :]], axis=-1)       # [B,1,N,3+D]
            else:
                grouped = grouped_xyz
            return new_xyz_t, grouped
        fps_idx = farthest_point_sample(xyz_t, self.npoint)                # [B,S]
        new_xyz_t = index_points(xyz_t, fps_idx)                           # [B,S,3]
        idx = query_ball_point(self.radius, self.nsample, xyz_t, new_xyz_t)
        grouped_xyz = index_points(xyz_t, idx)                             # [B,S,K,3]
        grouped_xyz_norm = grouped_xyz - new_xyz_t[:, :, None, :]
        if points_t is not None:
            grouped_points = index_points(points_t, idx)                   # [B,S,K,D]
            grouped = jnp.concatenate([grouped_xyz_norm, grouped_points], axis=-1)
        else:
            grouped = grouped_xyz_norm
        return new_xyz_t, grouped                                          # [B,S,K,3+D]

    def __call__(self, xyz, points, *, tn_target=128):
        # xyz [B, 3, N], points [B, D, N] or None  (PyTorch channel-first)
        xyz_t = jnp.transpose(xyz, (0, 2, 1))
        points_t = None if points is None else jnp.transpose(points, (0, 2, 1))
        new_xyz_t, grouped = self._group(xyz_t, points_t)                  # [B,S,K,C0]
        ws, bs = self._folded_params()
        new_points = mlp_max_pallas(grouped, ws, bs, tn_target=tn_target)  # [B,C_out,S]
        new_xyz = jnp.transpose(new_xyz_t, (0, 2, 1))                      # [B,3,S]
        return new_xyz, new_points


# ----------------------------- Demo ---------------------------------------------

if __name__ == "__main__":
    key = jax.random.PRNGKey(0)
    key, kxyz, kpts, kparam = jax.random.split(key, 4)

    B, N, D = 2, 16, 4          # small demo shapes
    npoint, radius, nsample = 8, 0.8, 8
    in_channel = D + 3          # reference convention: in_channel includes the +3
    mlp = [16, 32]

    xyz = jax.random.normal(kxyz, (B, 3, N), jnp.float32)
    points = jax.random.normal(kpts, (B, D, N), jnp.float32)

    module = PointNetSetAbstractionPallas(npoint, radius, nsample,
                                          in_channel, mlp, False, kparam)

    forward = jax.jit(module.__call__)
    new_xyz, new_points = forward(xyz, points)
    jax.block_until_ready(new_xyz)
    jax.block_until_ready(new_points)

    assert new_xyz.shape == (B, 3, npoint)
    assert new_points.shape == (B, mlp[-1], npoint)
    assert bool(jnp.all(jnp.isfinite(new_points)))

    # ---- pure-JAX f32 reference (same grouping, unfused MLP) ----
    xyz_t = jnp.transpose(xyz, (0, 2, 1))
    points_t = jnp.transpose(points, (0, 2, 1))
    new_xyz_ref_t, grouped = module._group(xyz_t, points_t)
    h = grouped
    for (W, bias, gamma, beta, mean, var) in module.params:
        h = jnp.einsum("bskc,cd->bskd", h, W) + bias
        h = gamma * (h - mean) / jnp.sqrt(var + module.eps) + beta
        h = jnp.maximum(h, 0.0)
    ref = jnp.transpose(jnp.max(h, axis=2), (0, 2, 1))            # [B, C_out, S]

    err = float(jnp.max(jnp.abs(new_points - ref)))
    assert err < 0.2, f"mismatch vs reference: max abs err = {err}"
    assert float(jnp.max(jnp.abs(new_xyz - jnp.transpose(new_xyz_ref_t, (0, 2, 1))))) == 0.0

    print("KERNEL_OK")
</pallas_src>

<mosaic_0001>
module attributes {stable_mosaic.version = 11 : i64} {
  func.func @_mlp_max_kernel(%arg0: i32, %arg1: i32, %arg2: memref<1x64x7xbf16, #tpu.memory_space<vmem>>, %arg3: memref<7x16xbf16, #tpu.memory_space<vmem>>, %arg4: memref<1x16xf32, #tpu.memory_space<vmem>>, %arg5: memref<16x32xbf16, #tpu.memory_space<vmem>>, %arg6: memref<1x32xf32, #tpu.memory_space<vmem>>, %arg7: memref<1x32x8xf32, #tpu.memory_space<vmem>>) attributes {dimension_semantics = [#tpu.dimension_semantics<parallel>, #tpu.dimension_semantics<parallel>], iteration_bounds = array<i64: 1, 2>, scalar_prefetch = 0 : i64, scratch_operands = 0 : i64, tpu.core_type = #tpu.core_type<tc>, window_params = [{transform_indices = @transform_0, window_bounds = array<i64: 1, 64, 7>}, {pipeline_mode = #tpu.pipeline_mode<synchronous>, transform_indices = @transform_1, window_bounds = array<i64: 7, 16>}, {pipeline_mode = #tpu.pipeline_mode<synchronous>, transform_indices = @transform_2, window_bounds = array<i64: 1, 16>}, {pipeline_mode = #tpu.pipeline_mode<synchronous>, transform_indices = @transform_3, window_bounds = array<i64: 16, 32>}, {pipeline_mode = #tpu.pipeline_mode<synchronous>, transform_indices = @transform_4, window_bounds = array<i64: 1, 32>}, {transform_indices = @transform_5, window_bounds = array<i64: 1, 32, 8>}]} {
    %c0 = arith.constant 0 : index
    %c0_0 = arith.constant 0 : index
    %c0_1 = arith.constant 0 : index
    %0 = vector.load %arg2[%c0, %c0_0, %c0_1] : memref<1x64x7xbf16, #tpu.memory_space<vmem>>, vector<1x64x7xbf16>
    %1 = vector.shape_cast %0 : vector<1x64x7xbf16> to vector<64x7xbf16>
    %c0_2 = arith.constant 0 : index
    %c0_3 = arith.constant 0 : index
    %2 = vector.load %arg3[%c0_2, %c0_3] : memref<7x16xbf16, #tpu.memory_space<vmem>>, vector<7x16xbf16>
    %c0_4 = arith.constant 0 : index
    %c0_5 = arith.constant 0 : index
    %3 = vector.load %arg4[%c0_4, %c0_5] : memref<1x16xf32, #tpu.memory_space<vmem>>, vector<1x16xf32>
    %cst = arith.constant dense<0.000000e+00> : vector<64x16xf32>
    %4 = tpu.matmul %1, %2, %cst {dimension_numbers = #tpu.dot_dimension_numbers<[1], [0], [0], [1], [0, 0, 1, 1], [], []>} : vector<64x7xbf16>, vector<7x16xbf16>, vector<64x16xf32> -> vector<64x16xf32>
    %5 = vector.broadcast %3 : vector<1x16xf32> to vector<64x16xf32>
    %6 = arith.addf %4, %5 : vector<64x16xf32>
    %cst_6 = arith.constant 0.000000e+00 : f32
    %7 = vector.broadcast %cst_6 : f32 to vector<64x16xf32>
    %8 = arith.maximumf %6, %7 : vector<64x16xf32>
    %c0_7 = arith.constant 0 : index
    %c0_8 = arith.constant 0 : index
    %9 = vector.load %arg5[%c0_7, %c0_8] : memref<16x32xbf16, #tpu.memory_space<vmem>>, vector<16x32xbf16>
    %c0_9 = arith.constant 0 : index
    %c0_10 = arith.constant 0 : index
    %10 = vector.load %arg6[%c0_9, %c0_10] : memref<1x32xf32, #tpu.memory_space<vmem>>, vector<1x32xf32>
    %11 = arith.truncf %8 : vector<64x16xf32> to vector<64x16xbf16>
    %cst_11 = arith.constant dense<0.000000e+00> : vector<64x32xf32>
    %12 = tpu.matmul %11, %9, %cst_11 {dimension_numbers = #tpu.dot_dimension_numbers<[1], [0], [0], [1], [0, 0, 1, 1], [], []>} : vector<64x16xbf16>, vector<16x32xbf16>, vector<64x32xf32> -> vector<64x32xf32>
    %13 = vector.broadcast %10 : vector<1x32xf32> to vector<64x32xf32>
    %14 = arith.addf %12, %13 : vector<64x32xf32>
    %cst_12 = arith.constant 0.000000e+00 : f32
    %15 = vector.broadcast %cst_12 : f32 to vector<64x32xf32>
    %16 = arith.maximumf %14, %15 : vector<64x32xf32>
    %17 = vector.shape_cast %16 : vector<64x32xf32> to vector<8x8x32xf32>
    %cst_13 = arith.constant dense<0xFF800000> : vector<8x32xf32>
    %18 = vector.multi_reduction <maximumf>, %17, %cst_13 [1] : vector<8x8x32xf32> to vector<8x32xf32>
    %19 = tpu.transpose %18, [1, 0] : vector<8x32xf32> -> vector<32x8xf32>
    %c0_14 = arith.constant 0 : index
    %c0_15 = arith.constant 0 : index
    %c0_16 = arith.constant 0 : index
    %20 = vector.load %arg7[%c0_14, %c0_15, %c0_16] : memref<1x32x8xf32, #tpu.memory_space<vmem>>, vector<1x32x8xf32>
    %21 = vector.shape_cast %20 : vector<1x32x8xf32> to vector<32x8xf32>
    %22 = vector.shape_cast %19 : vector<32x8xf32> to vector<1x32x8xf32>
    tpu.vector_store %arg7[%c0_14, %c0_15, %c0_16], %22 {strides = array<i32>} : memref<1x32x8xf32, #tpu.memory_space<vmem>>, vector<1x32x8xf32>,
    return
  }
  func.func @transform_0(%arg0: i32, %arg1: i32) -> (i32, i32, i32) {
    %c0_i32 = arith.constant 0 : i32
    %c0_i32_0 = arith.constant 0 : i32
    return %arg1, %arg0, %c0_i32 : i32, i32, i32
  }
  func.func @transform_1(%arg0: i32, %arg1: i32) -> (i32, i32) {
    %c0_i32 = arith.constant 0 : i32
    %c0_i32_0 = arith.constant 0 : i32
    %c0_i32_1 = arith.constant 0 : i32
    return %c0_i32, %c0_i32_0 : i32, i32
  }
  func.func @transform_2(%arg0: i32, %arg1: i32) -> (i32, i32) {
    %c0_i32 = arith.constant 0 : i32
    %c0_i32_0 = arith.constant 0 : i32
    %c0_i32_1 = arith.constant 0 : i32
    return %c0_i32, %c0_i32_0 : i32, i32
  }
  func.func @transform_3(%arg0: i32, %arg1: i32) -> (i32, i32) {
    %c0_i32 = arith.constant 0 : i32
    %c0_i32_0 = arith.constant 0 : i32
    %c0_i32_1 = arith.constant 0 : i32
    return %c0_i32, %c0_i32_0 : i32, i32
  }
  func.func @transform_4(%arg0: i32, %arg1: i32) -> (i32, i32) {
    %c0_i32 = arith.constant 0 : i32
    %c0_i32_0 = arith.constant 0 : i32
    %c0_i32_1 = arith.constant 0 : i32
    return %c0_i32, %c0_i32_0 : i32, i32
  }
  func.func @transform_5(%arg0: i32, %arg1: i32) -> (i32, i32, i32) {
    %c0_i32 = arith.constant 0 : i32
    %c0_i32_0 = arith.constant 0 : i32
    return %arg1, %c0_i32, %arg0 : i32, i32, i32
  }
}

</mosaic_0001>

<bundles_post_ra>
// kernel: custom-call.8
= control target key start
LH: loop header
LB: loop body
LE: loop exit
PB: predicated region body
PF: predicated region fallthrough
CT: control target
= control target key end

     0   :  { %s6_s0 = inlined_call_operand.vmem [shape: f32[2,16], index: 0, kind: output, shape index: {}]  }

// kernel: a_call__.1
= control target key start
LH: loop header
LB: loop body
LE: loop exit
PB: predicated region body
PF: predicated region fallthrough
CT: control target
= control target key end

     0   :  { %s840_s18 = smov 0   ;;  %s842_s19 = smov 0   ;;  %s904_s0 = inlined_call_operand.vmem [shape: bf16[2,64,7], index: 0, kind: input, shape index: {}]   ;;  %s905_s1 = inlined_call_operand.vmem [shape: bf16[7,16], index: 1, kind: input, shape index: {}]   ;;  %s906_s2 = inlined_call_operand.vmem [shape: f32[1,16], index: 2, kind: input, shape index: {}]   ;;  %s907_s3 = inlined_call_operand.vmem [shape: bf16[16,32], index: 3, kind: input, shape index: {}]   ;;  %s908_s4 = inlined_call_operand.vmem [shape: f32[1,32], index: 4, kind: input, shape index: {}]   ;;  %s909_s5 = inlined_call_operand.vmem [shape: f32[2,32,8], index: 5, kind: output, shape index: {}]  }
   0x1   :  { %s844_s20 = smov 0  }
   0x2 LB: > { %s24_s21 = sadd.s32 1, %s803_s19  ;;  %p700_p0 = scmp.ge.s32.totalorder %s807_s20, 1  ;;  %s807_s20 = sphi %s844_s20, %s15_s20   ;;  %s803_s19 = sphi %s842_s19, %s911_s19   ;;  %s799_s18 = sphi %s840_s18, %s910_s18  }
   0x3   : > { %p25_p1 = scmp.ge.s32.totalorder %s24_s21, 2  ;;  %p208_p2 = scmp.lt.s32.totalorder %s807_s20, 3 }
   0x5   : > { %s913_s21 = smov (%p25_p1, %s24_s21), 0  ;;  %p209_p3 = pnand %p700_p0, %p208_p2 }
   0x6   : > { %v270_v0 = vld [vmem:[%s905_s1] sm:$0xf] (!%p209_p3)  ;;  %vm311_vm0 = vcmask (!%p209_p3), 1042432   ;;  %vm312_vm1 = vcmask (!%p209_p3), 1043456   ;;  %p244_p4 = scmp.lt.s32.totalorder (!%p209_p3), %s799_s18, 1  ;;  %v809_v1 = vmov (!%p209_p3), 65535  }
   0x7   : > { %212 = sbr.rel (%p209_p3) target bundleno = 628 (0x274), region = 40  ;;  %v313_v2 = vsel (!%p209_p3), %vm311_vm0, 4294967295, %v809_v1  ;;  %vm298_vm2 = vcmask (!%p209_p3), 56320   ;;  %v784_v9 = vld [vmem:[%s907_s3] sm:$0xff] (!%p209_p3)   ;;  %vm410_vm3 = vcmask (!%p209_p3), 130048   ;;  %vm496_vm4 = vcmask (!%p209_p3), 261120  }
   0x8   : > { %v314_v3 = vsel (!%p209_p3), %vm312_vm1, %v313_v2, 0  ;;  %744 = vmatprep.subr.bf16.mxu1 (!%p209_p3), %v784_v9  ;;  %v705_v10 = vld [vmem:[%s906_s2] ss:$0 sm:$0xff] (!%p209_p3)  ;;  %vm561_vm5 = vcmask (!%p209_p3), 1041409   ;;  %vm563_vm6 = vcmask (!%p209_p3), 1042434   ;;  %vm565_vm7 = vcmask (!%p209_p3), 1043459  }
   0x9   : > { %v316_v4 = vand.u32 (!%p209_p3), %v314_v3, %v270_v0  ;;  %745 = vmatpush3.bf16.msra.mxu1 (!%p209_p3), %v784_v9  ;;  %v714_v39 = vld [vmem:[%s908_s4] ss:$0 sm:$0xff] (!%p209_p3)  ;;  %vm567_vm8 = vcmask (!%p209_p3), 1044484   ;;  %vm569_vm9 = vcmask (!%p209_p3), 1045509   ;;  %vm571_vm10 = vcmask (!%p209_p3), 1046534  }
   0xa   : > { %vm573_vm11 = vcmask (!%p209_p3), 1047559   ;;  %vm608_vm12 = vcmask (!%p209_p3), 64512  }
   0xb   : > { %734 = vmatprep.subr.bf16.mxu0 (!%p209_p3), %v316_v4 }
   0xc   : > { %735 = vmatpush3.bf16.msra.mxu0 (!%p209_p3), %v316_v4 }
   0xe   : > { %s915_s18 = smov (!%p244_p4, %s799_s18), 1 }
   0xf   : > { %s722_s24 = sshll.u32 %s915_s18, 5 }
  0x10   : > { %s251_s27 = scalar_lea.vmem %s904_s0, %s722_s24  ;;  %s260_s11 = scalar_lea.vmem %s909_s5, %s722_s24 }
  0x11   : > { %v780_v5 = vld [vmem:[%s251_s27] sm:$0xff]   ;;  %v781_v6 = vld [vmem:[%s251_s27 + $0x8] sm:$0xff]   ;;  %v782_v7 = vld [vmem:[%s251_s27 + $0x10] sm:$0xff]  }
  0x12   : > { %736 = vmatprep.mubr.msk.bf16.mxu0 %vm298_vm2, %v780_v5  ;;  %v783_v8 = vld [vmem:[%s251_s27 + $0x18] sm:$0xff]  }
  0x13   : > { %737 = vmatmul.mubr.msk.bf16.vlgmr.msra.gmra.mrb[0].mxu0 %vm298_vm2, %v781_v6 }
  0x14   : > { %740 = vmatprep.mubr.msk.bf16.mxu0 %vm298_vm2, %v782_v7 }
  0x1b   : > { %741 = vmatmul.mubr.msk.bf16.gmra.mrb[4].mxu0 %vm298_vm2, %v783_v8 }
  0xe6   : > { %v738_v11 = vpop.f32.mrb[0].mxu0 }
  0xe7   : > { %v361_v12 = vadd.f32 %v738_v11, %v705_v10  ;;  %v352_v13 = vpop.f32.mrb[1].mxu0 }
  0xe8   : > { %v353_v14 = vadd.f32 %v705_v10, %v352_v13  ;;  %v739_v15 = vpop.f32.mrb[2].mxu0 }
  0xe9   : > { %v364_v16 = vadd.f32 %v739_v15, %v705_v10  ;;  %v355_v17 = vpop.f32.mrb[3].mxu0  ;;  %v385_v19 = vmax.f32 %v361_v12, 0.0 }
  0xea   : > { %v356_v18 = vadd.f32 %v705_v10, %v355_v17  ;;  %v383_v21 = vmax.f32 %v353_v14, 0.0 }
  0xeb   : > { %v386_v20 = vmax.f32 %v364_v16, 0.0 }
  0xec   : > { %v384_v22 = vmax.f32 %v356_v18, 0.0 }
  0xed   : > { %v395_v23 = vpack.c.bf16 %v386_v20, %v385_v19 }
  0xee   : > { %v742_v24 = vpop.f32.mrb[4].mxu0  ;;  %v394_v25 = vpack.c.bf16 %v384_v22, %v383_v21 }
  0xef   : > { %v377_v26 = vadd.f32 %v742_v24, %v705_v10  ;;  %v368_v27 = vpop.f32.mrb[5].mxu0 }
  0xf0   : > { %v369_v28 = vadd.f32 %v705_v10, %v368_v27  ;;  %v743_v29 = vpop.f32.mrb[6].mxu0  ;;  %746 = vmatprep.mubr.msk.bf16.mxu1 %vm410_vm3, %v394_v25 }
  0xf1   : > { %v380_v30 = vadd.f32 %v743_v29, %v705_v10  ;;  %v371_v31 = vpop.f32.mrb[7].mxu0  ;;  %747 = vmatmul.mubr.msk.bf16.vlgmr.msra.gmra.mrb[0].mxu1 %vm410_vm3, %v395_v23  ;;  %v389_v33 = vmax.f32 %v377_v26, 0.0 }
  0xf2   : > { %v372_v32 = vadd.f32 %v705_v10, %v371_v31  ;;  %v387_v35 = vmax.f32 %v369_v28, 0.0 }
  0xf3   : > { %v390_v34 = vmax.f32 %v380_v30, 0.0 }
  0xf4   : > { %v388_v36 = vmax.f32 %v372_v32, 0.0 }
  0xf5   : > { %v397_v37 = vpack.c.bf16 %v390_v34, %v389_v33 }
  0xf6   : > { %v396_v38 = vpack.c.bf16 %v388_v36, %v387_v35 }
  0xf8   : > { %750 = vmatprep.mubr.msk.bf16.mxu1 %vm410_vm3, %v396_v38 }
  0xf9   : > { %751 = vmatmul.mubr.msk.bf16.gmra.mrb[4].mxu1 %vm410_vm3, %v397_v37 }
 0x1c4   : > { %v748_v40 = vpop.f32.mrb[0].mxu1 }
 0x1c5   : > { %v466_v41 = vadd.f32 %v748_v40, %v714_v39  ;;  %v457_v42 = vpop.f32.mrb[1].mxu1 }
 0x1c6   : > { %v458_v43 = vadd.f32 %v714_v39, %v457_v42  ;;  %v749_v44 = vpop.f32.mrb[2].mxu1 }
 0x1c7   : > { %v490_v45 = vmax.f32 %v466_v41, 0.0  ;;  %v469_v46 = vadd.f32 %v749_v44, %v714_v39  ;;  %v460_v47 = vpop.f32.mrb[3].mxu1 }
 0x1c8   : > { %v488_v48 = vmax.f32 %v458_v43, 0.0  ;;  %v461_v49 = vadd.f32 %v714_v39, %v460_v47 }
 0x1c9   : > { %v511_v50 = vsel %vm496_vm4, %v490_v45, -inf  ;;  %v491_v51 = vmax.f32 %v469_v46, 0.0 }
 0x1ca   : > { %v512_v52 = vrot.slane %v511_v50, 4  ;;  %v497_v53 = vsel %vm496_vm4, %v488_v48, -inf  ;;  %v489_v54 = vmax.f32 %v461_v49, 0.0 }
 0x1cb   : > { %v498_v55 = vrot.slane %v497_v53, 4  ;;  %v518_v56 = vsel %vm496_vm4, %v491_v51, -inf }
 0x1cc   : > { %v513_v57 = vmax.f32 %v511_v50, %v512_v52  ;;  %v519_v58 = vrot.slane %v518_v56, 4  ;;  %v504_v59 = vsel %vm496_vm4, %v489_v54, -inf  ;;  %v752_v60 = vpop.f32.mrb[4].mxu1 }
 0x1cd   : > { %v499_v61 = vmax.f32 %v497_v53, %v498_v55  ;;  %v505_v62 = vrot.slane %v504_v59, 4  ;;  %v482_v63 = vadd.f32 %v752_v60, %v714_v39  ;;  %v473_v0 = vpop.f32.mrb[5].mxu1 }
 0x1ce   : > { %v514_v1 = vrot.slane %v513_v57, 2  ;;  %v520_v2 = vmax.f32 %v518_v56, %v519_v58  ;;  %v474_v3 = vadd.f32 %v714_v39, %v473_v0  ;;  %v753_v4 = vpop.f32.mrb[6].mxu1 }
 0x1cf   : > { %v500_v5 = vrot.slane %v499_v61, 2  ;;  %v506_v6 = vmax.f32 %v504_v59, %v505_v62  ;;  %v494_v7 = vmax.f32 %v482_v63, 0.0  ;;  %v485_v8 = vadd.f32 %v753_v4, %v714_v39  ;;  %v476_v9 = vpop.f32.mrb[7].mxu1 }
 0x1d0   : > { %v515_v10 = vmax.f32 %v513_v57, %v514_v1  ;;  %v521_v11 = vrot.slane %v520_v2, 2  ;;  %v492_v12 = vmax.f32 %v474_v3, 0.0  ;;  %v477_v13 = vadd.f32 %v714_v39, %v476_v9 }
 0x1d1   : > { %v501_v14 = vmax.f32 %v499_v61, %v500_v5  ;;  %v507_v15 = vrot.slane %v506_v6, 2  ;;  %v539_v16 = vsel %vm496_vm4, %v494_v7, -inf  ;;  %v495_v17 = vmax.f32 %v485_v8, 0.0 }
 0x1d2   : > { %v522_v18 = vmax.f32 %v520_v2, %v521_v11  ;;  %v540_v19 = vrot.slane %v539_v16, 4  ;;  %v525_v20 = vsel %vm496_vm4, %v492_v12, -inf  ;;  %v516_v25 = vrot.slane %v515_v10, 1 }
 0x1d3   : > { %v502_v21 = vrot.slane %v501_v14, 1  ;;  %v508_v22 = vmax.f32 %v506_v6, %v507_v15  ;;  %v526_v23 = vrot.slane %v525_v20, 4  ;;  %v546_v24 = vsel %vm496_vm4, %v495_v17, -inf }
 0x1d4   : > { %v541_v26 = vmax.f32 %v539_v16, %v540_v19  ;;  %v547_v27 = vrot.slane %v546_v24, 4  ;;  %v523_v28 = vrot.slane %v522_v18, 1  ;;  %v493_v31 = vmax.f32 %v477_v13, 0.0 }
 0x1d5   : > { %v509_v29 = vrot.slane %v508_v22, 1  ;;  %v527_v30 = vmax.f32 %v525_v20, %v526_v23  ;;  %v503_v32 = vmax.f32 %v501_v14, %v502_v21  ;;  %v517_v38 = vmax.f32 %v515_v10, %v516_v25 }
 0x1d6   : > { %v548_v33 = vmax.f32 %v546_v24, %v547_v27  ;;  %v542_v35 = vrot.slane %v541_v26, 2  ;;  %v532_v37 = vsel %vm496_vm4, %v493_v31, -inf  ;;  %v524_v41 = vmax.f32 %v522_v18, %v523_v28 }
 0x1d7   : > { %v510_v34 = vmax.f32 %v508_v22, %v509_v29  ;;  %v528_v36 = vrot.slane %v527_v30, 2  ;;  %v533_v40 = vrot.slane %v532_v37, 4 }
 0x1d8   : > { %v549_v39 = vrot.slane %v548_v33, 2  ;;  %v543_v46 = vmax.f32 %v541_v26, %v542_v35 }
 0x1d9   : > { %v562_v42 = vsel %vm561_vm5, %v510_v34, %v503_v32  ;;  %v529_v43 = vmax.f32 %v527_v30, %v528_v36  ;;  %v534_v44 = vmax.f32 %v532_v37, %v533_v40 }
 0x1da   : > { %v564_v45 = vsel %vm563_vm6, %v517_v38, %v562_v42  ;;  %v550_v49 = vmax.f32 %v548_v33, %v549_v39  ;;  %v544_v53 = vrot.slane %v543_v46, 1 }
 0x1db   : > { %v530_v47 = vrot.slane %v529_v43, 1  ;;  %v566_v48 = vsel %vm565_vm7, %v524_v41, %v564_v45  ;;  %v535_v50 = vrot.slane %v534_v44, 2 }
 0x1dc   : > { %v551_v56 = vrot.slane %v550_v49, 1  ;;  %v545_v58 = vmax.f32 %v543_v46, %v544_v53 }
 0x1dd   : > { %v531_v51 = vmax.f32 %v529_v43, %v530_v47  ;;  %v536_v52 = vmax.f32 %v534_v44, %v535_v50 }
 0x1de   : > { %v552_v59 = vmax.f32 %v550_v49, %v551_v56 }
 0x1df   : > { %v568_v54 = vsel %vm567_vm8, %v531_v51, %v566_v48  ;;  %v537_v55 = vrot.slane %v536_v52, 1 }
 0x1e1   : > { %v538_v57 = vmax.f32 %v536_v52, %v537_v55 }
 0x1e3   : > { %v570_v60 = vsel %vm569_vm9, %v538_v57, %v568_v54 }
 0x1e4   : > { %v572_v61 = vsel %vm571_vm10, %v545_v58, %v570_v60 }
 0x1e5   : > { %v574_v62 = vsel %vm573_vm11, %v552_v59, %v572_v61 }
 0x1e6   : > { %576 = vxpose.xlu0.b32.start.end [1/1] (short) (narrow) %v574_v62, 32 }
 0x266   : > { %v592_v63 = vpop.trf.xlu0 }
 0x267   : > { %609 = vst.msk [vmem:[%s260_s11] sm:$0xff] %vm608_vm12, %v592_v63 }
 0x26a   : > { %v593_v0 = vpop.trf.xlu0 }
 0x26b   : > { %610 = vst.msk [vmem:[%s260_s11 + $0x8] sm:$0xff] %vm608_vm12, %v593_v0 }
 0x26e   : > { %v594_v1 = vpop.trf.xlu0 }
 0x26f   : > { %611 = vst.msk [vmem:[%s260_s11 + $0x10] sm:$0xff] %vm608_vm12, %v594_v1 }
 0x272   : > { %v595_v2 = vpop.trf.xlu0 }
 0x273   : > { %612 = vst.msk [vmem:[%s260_s11 + $0x18] sm:$0xff] %vm608_vm12, %v595_v2 }
 0x274 PF: > { %s15_s20 = sadd.s32 1, %s807_s20   ;;  %s910_s18 = smov %s803_s19 }
 0x275   : > { %p12_p5 = scmp.ge.s32.totalorder %s15_s20, 4   ;;  %s911_s19 = smov %s913_s21 }
 0x277   :  { %14 = sbr.rel (!%p12_p5) target bundleno = 2 (0x2), region = 70 }

</bundles_post_ra>
